<compile_context>
chip_gen: v7x
topology: tpu7x:2x2x1
jax: 0.10.0
libtpu: 0.0.40
codegen_flags: <defaults>
</compile_context>

<pallas_src>
import functools

import jax
import jax.numpy as jnp
from jax.experimental import pallas as pl
from jax.experimental.pallas import tpu as pltpu


def _round_up(x, m):
    return ((x + m - 1) // m) * m


def _cdiv(a, b):
    return -(-a // b)


def _tpu_info():
    try:
        return pltpu.get_tpu_info()
    except Exception:
        return None


def _vmem_limit_bytes():
    info = _tpu_info()
    cap = getattr(info, "vmem_capacity_bytes", None) if info is not None else None
    if not cap:
        cap = 128 << 20
    # Leave ~16 MiB headroom for Mosaic internal scratch / double-buffered x,out.
    return int(max(32 << 20, cap - (16 << 20)))


def _num_tensorcores():
    info = _tpu_info()
    for name in ("num_cores", "core_count", "num_tensorcores"):
        n = getattr(info, name, None) if info is not None else None
        if isinstance(n, int) and n > 0:
            return n
    return 1


def _mlp_kernel(*refs, n_layers):
    """Fused MLP forward on one batch tile.

    refs = (x, w0, b0, w1, b1, ..., w_{L-1}, b_{L-1}, out)
    Weights are bf16, biases f32; matmuls accumulate in f32 on the MXU.
    Hidden layers use ReLU; the final Linear has no activation
    (matches nn.Sequential([Linear, ReLU, ..., Linear])).
    """
    x_ref = refs[0]
    out_ref = refs[-1]
    p = refs[1:-1]

    h = x_ref[...].astype(p[0].dtype)                     # (TM, in) f32 -> bf16
    for li in range(n_layers):
        w = p[2 * li][...]                                # (in, out) bf16
        b = p[2 * li + 1][...]                            # (1, out) f32, broadcasts
        acc = jnp.dot(h, w, preferred_element_type=jnp.float32) + b
        if li != n_layers - 1:
            h = jnp.maximum(acc, 0.0).astype(w.dtype)     # ReLU, back to bf16
        else:
            h = acc                                       # final layer stays f32
    out_ref[...] = h.astype(out_ref.dtype)


def prepare_nn_actor_params(params, *, weight_dtype=jnp.bfloat16):
    """One-time parameter prep, hoisted out of the per-step forward.

    Casts weights to bf16 (halves VMEM/HBM footprint, fast MXU path) and
    reshapes biases to (1, out) f32. No padding is needed because the kernel's
    BlockSpecs use full-extent feature dims.
    """
    prepared = []
    for w, b in params:
        prepared.append((jnp.asarray(w, weight_dtype),
                         jnp.asarray(b, jnp.float32).reshape(1, -1)))
    return prepared


def _choose_batch_tile(batch, num_cores, *, max_tile=1024, align=16):
    """Batch tile: minimal padding, grid length a multiple of the TC count.

    align=16 keeps bf16 activation sublanes fully packed (also satisfies the
    8-row requirement of the f32 x / out tiles).
    """
    n_steps = max(1, _cdiv(batch, max_tile))
    if num_cores > 1:
        n_steps = _cdiv(max(n_steps, num_cores), num_cores) * num_cores
    # Never create pure-padding tiles for tiny batches.
    n_steps = min(n_steps, max(1, _cdiv(batch, align)))
    return _round_up(_cdiv(batch, n_steps), align)


def nn_actor_forward(x, prepared_params, *, max_batch_tile=1024):
    """Run the fused MLP Pallas kernel.

    x:               (batch, obs_dim) float32
    prepared_params: output of prepare_nn_actor_params
                     (bf16 W of shape (in, out), f32 b of shape (1, out))
    """
    batch, obs_dim = x.shape
    n_layers = len(prepared_params)
    dims = [obs_dim] + [w.shape[1] for (w, _) in prepared_params]
    out_dim = dims[-1]

    num_cores = _num_tensorcores()
    tm = _choose_batch_tile(batch, num_cores, max_tile=max_batch_tile)
    batch_pad = _round_up(batch, tm)
    if batch_pad != batch:
        # Row-only pad (feature dims stay exact); padded rows are sliced off.
        x = jnp.pad(x, ((0, batch_pad - batch), (0, 0)))

    flat_args = [x]
    # Full-extent feature dims -> exempt from the (8,128) divisibility rule,
    # so no lane padding of x / W / out is required.
    in_specs = [pl.BlockSpec((tm, obs_dim), lambda i: (i, 0))]
    for w, b in prepared_params:
        flat_args.append(w)
        flat_args.append(b)
        # Constant index_map -> params stay VMEM-resident across batch tiles;
        # single buffer since the block never changes (saves VMEM on v7x).
        in_specs.append(pl.BlockSpec(w.shape, lambda i: (0, 0),
                                     pipeline_mode=pl.Buffered(1)))
        in_specs.append(pl.BlockSpec(b.shape, lambda i: (0, 0),
                                     pipeline_mode=pl.Buffered(1)))
    out_specs = pl.BlockSpec((tm, out_dim), lambda i: (i, 0))
    grid = (batch_pad // tm,)

    flops = 2 * batch_pad * sum(dims[l] * dims[l + 1] for l in range(n_layers))
    bytes_accessed = (4 * batch_pad * obs_dim + 4 * batch_pad * out_dim
                      + sum(2 * dims[l] * dims[l + 1] + 4 * dims[l + 1]
                            for l in range(n_layers)))
    cost = pl.CostEstimate(flops=flops, transcendentals=0,
                           bytes_accessed=bytes_accessed)

    # TODO(synk): if bf16 weights alone approach the per-core VMEM limit for a
    # very large hidden_num, add a K/N reduction grid axis (f32 accumulator
    # scratch + pl.when) instead of keeping all layers fully resident.
    out = pl.pallas_call(
        functools.partial(_mlp_kernel, n_layers=n_layers),
        grid=grid,
        in_specs=in_specs,
        out_specs=out_specs,
        out_shape=jax.ShapeDtypeStruct((batch_pad, out_dim), jnp.float32),
        compiler_params=pltpu.CompilerParams(
            dimension_semantics=("parallel",),
            vmem_limit_bytes=_vmem_limit_bytes(),
        ),
        cost_estimate=cost,
    )(*flat_args)
    return out[:batch] if batch_pad != batch else out


def init_nn_actor_params(key, obs_dim, output_dim, hidden_num, layer_num):
    """Deterministic init matching the module's layer structure.

    trunk = [Linear(obs, hid), ReLU] + (layer_num-1)*[Linear(hid, hid), ReLU]
            + [Linear(hid, out)]
    Uses PyTorch-default-style uniform(-1/sqrt(fan_in), 1/sqrt(fan_in)).
    Weights stored transposed vs. nn.Linear: (in_features, out_features).
    """
    dims = [obs_dim] + [hidden_num] * layer_num + [output_dim]
    params = []
    for i in range(len(dims) - 1):
        fan_in, fan_out = dims[i], dims[i + 1]
        key, kw, kb = jax.random.split(key, 3)
        bound = 1.0 / (fan_in ** 0.5)
        w = jax.random.uniform(kw, (fan_in, fan_out), jnp.float32, -bound, bound)
        b = jax.random.uniform(kb, (fan_out,), jnp.float32, -bound, bound)
        params.append((w, b))
    return params


def nn_actor_reference(x, params):
    """Pure-JAX f32 reference for correctness checking."""
    h = x
    for i, (w, b) in enumerate(params):
        h = h @ w + b
        if i != len(params) - 1:
            h = jnp.maximum(h, 0.0)
    return h


if __name__ == "__main__":
    # Shapes consistent with the module's forward:
    # batch=4, NN_obs_dim=16, NN_hidden_num=32, NN_layer_num=2, NN_output_dim=8
    batch, obs_dim, hidden_num, layer_num, output_dim = 4, 16, 32, 2, 8

    key = jax.random.PRNGKey(0)
    key, kx = jax.random.split(key)
    x = jax.random.normal(kx, (batch, obs_dim), dtype=jnp.float32)
    params = init_nn_actor_params(key, obs_dim, output_dim, hidden_num, layer_num)
    prepared = prepare_nn_actor_params(params)   # one-time prep (hoisted)

    out = jax.block_until_ready(nn_actor_forward(x, prepared))
    ref = nn_actor_reference(x, params)
    assert out.shape == (batch, output_dim)
    # bf16 weights/activations (f32 accumulation) -> loosened tolerance.
    assert jnp.allclose(out, ref, atol=3e-2, rtol=3e-2), \
        float(jnp.max(jnp.abs(out - ref)))

    # Larger, non-tile-multiple batch exercises the batch grid + row padding.
    key, kx2 = jax.random.split(key)
    x_big = jax.random.normal(kx2, (600, obs_dim), dtype=jnp.float32)
    out_big = jax.block_until_ready(
        nn_actor_forward(x_big, prepared, max_batch_tile=256))
    ref_big = nn_actor_reference(x_big, params)
    assert out_big.shape == (600, output_dim)
    assert jnp.allclose(out_big, ref_big, atol=3e-2, rtol=3e-2)

    print("KERNEL_OK")
</pallas_src>

<mosaic_0001>
module attributes {stable_mosaic.version = 11 : i64} {
  func.func @_mlp_kernel(%arg0: i32, %arg1: memref<16x16xf32, #tpu.memory_space<vmem>>, %arg2: memref<16x32xbf16, #tpu.memory_space<vmem>>, %arg3: memref<1x32xf32, #tpu.memory_space<vmem>>, %arg4: memref<32x32xbf16, #tpu.memory_space<vmem>>, %arg5: memref<1x32xf32, #tpu.memory_space<vmem>>, %arg6: memref<32x8xbf16, #tpu.memory_space<vmem>>, %arg7: memref<1x8xf32, #tpu.memory_space<vmem>>, %arg8: memref<16x8xf32, #tpu.memory_space<vmem>>) attributes {dimension_semantics = [#tpu.dimension_semantics<parallel>], iteration_bounds = array<i64: 1>, scalar_prefetch = 0 : i64, scratch_operands = 0 : i64, tpu.core_type = #tpu.core_type<tc>, window_params = [{transform_indices = @transform_0, window_bounds = array<i64: 16, 16>}, {pipeline_mode = #tpu.pipeline_mode<synchronous>, transform_indices = @transform_1, window_bounds = array<i64: 16, 32>}, {pipeline_mode = #tpu.pipeline_mode<synchronous>, transform_indices = @transform_2, window_bounds = array<i64: 1, 32>}, {pipeline_mode = #tpu.pipeline_mode<synchronous>, transform_indices = @transform_3, window_bounds = array<i64: 32, 32>}, {pipeline_mode = #tpu.pipeline_mode<synchronous>, transform_indices = @transform_4, window_bounds = array<i64: 1, 32>}, {pipeline_mode = #tpu.pipeline_mode<synchronous>, transform_indices = @transform_5, window_bounds = array<i64: 32, 8>}, {pipeline_mode = #tpu.pipeline_mode<synchronous>, transform_indices = @transform_6, window_bounds = array<i64: 1, 8>}, {transform_indices = @transform_7, window_bounds = array<i64: 16, 8>}]} {
    %c0 = arith.constant 0 : index
    %c0_0 = arith.constant 0 : index
    %0 = vector.load %arg1[%c0, %c0_0] : memref<16x16xf32, #tpu.memory_space<vmem>>, vector<16x16xf32>
    %1 = arith.truncf %0 : vector<16x16xf32> to vector<16x16xbf16>
    %c0_1 = arith.constant 0 : index
    %c0_2 = arith.constant 0 : index
    %2 = vector.load %arg2[%c0_1, %c0_2] : memref<16x32xbf16, #tpu.memory_space<vmem>>, vector<16x32xbf16>
    %c0_3 = arith.constant 0 : index
    %c0_4 = arith.constant 0 : index
    %3 = vector.load %arg3[%c0_3, %c0_4] : memref<1x32xf32, #tpu.memory_space<vmem>>, vector<1x32xf32>
    %cst = arith.constant dense<0.000000e+00> : vector<16x32xf32>
    %4 = tpu.matmul %1, %2, %cst {dimension_numbers = #tpu.dot_dimension_numbers<[1], [0], [0], [1], [0, 0, 1, 1], [], []>} : vector<16x16xbf16>, vector<16x32xbf16>, vector<16x32xf32> -> vector<16x32xf32>
    %5 = vector.broadcast %3 : vector<1x32xf32> to vector<16x32xf32>
    %6 = arith.addf %4, %5 : vector<16x32xf32>
    %cst_5 = arith.constant 0.000000e+00 : f32
    %7 = vector.broadcast %cst_5 : f32 to vector<16x32xf32>
    %8 = arith.maximumf %6, %7 : vector<16x32xf32>
    %9 = arith.truncf %8 : vector<16x32xf32> to vector<16x32xbf16>
    %c0_6 = arith.constant 0 : index
    %c0_7 = arith.constant 0 : index
    %10 = vector.load %arg4[%c0_6, %c0_7] : memref<32x32xbf16, #tpu.memory_space<vmem>>, vector<32x32xbf16>
    %c0_8 = arith.constant 0 : index
    %c0_9 = arith.constant 0 : index
    %11 = vector.load %arg5[%c0_8, %c0_9] : memref<1x32xf32, #tpu.memory_space<vmem>>, vector<1x32xf32>
    %cst_10 = arith.constant dense<0.000000e+00> : vector<16x32xf32>
    %12 = tpu.matmul %9, %10, %cst_10 {dimension_numbers = #tpu.dot_dimension_numbers<[1], [0], [0], [1], [0, 0, 1, 1], [], []>} : vector<16x32xbf16>, vector<32x32xbf16>, vector<16x32xf32> -> vector<16x32xf32>
    %13 = vector.broadcast %11 : vector<1x32xf32> to vector<16x32xf32>
    %14 = arith.addf %12, %13 : vector<16x32xf32>
    %cst_11 = arith.constant 0.000000e+00 : f32
    %15 = vector.broadcast %cst_11 : f32 to vector<16x32xf32>
    %16 = arith.maximumf %14, %15 : vector<16x32xf32>
    %17 = arith.truncf %16 : vector<16x32xf32> to vector<16x32xbf16>
    %c0_12 = arith.constant 0 : index
    %c0_13 = arith.constant 0 : index
    %18 = vector.load %arg6[%c0_12, %c0_13] : memref<32x8xbf16, #tpu.memory_space<vmem>>, vector<32x8xbf16>
    %c0_14 = arith.constant 0 : index
    %c0_15 = arith.constant 0 : index
    %19 = vector.load %arg7[%c0_14, %c0_15] : memref<1x8xf32, #tpu.memory_space<vmem>>, vector<1x8xf32>
    %cst_16 = arith.constant dense<0.000000e+00> : vector<16x8xf32>
    %20 = tpu.matmul %17, %18, %cst_16 {dimension_numbers = #tpu.dot_dimension_numbers<[1], [0], [0], [1], [0, 0, 1, 1], [], []>} : vector<16x32xbf16>, vector<32x8xbf16>, vector<16x8xf32> -> vector<16x8xf32>
    %21 = vector.broadcast %19 : vector<1x8xf32> to vector<16x8xf32>
    %22 = arith.addf %20, %21 : vector<16x8xf32>
    %c0_17 = arith.constant 0 : index
    %c0_18 = arith.constant 0 : index
    %23 = vector.load %arg8[%c0_17, %c0_18] : memref<16x8xf32, #tpu.memory_space<vmem>>, vector<16x8xf32>
    tpu.vector_store %arg8[%c0_17, %c0_18], %22 {strides = array<i32>} : memref<16x8xf32, #tpu.memory_space<vmem>>, vector<16x8xf32>,
    return
  }
  func.func @transform_0(%arg0: i32) -> (i32, i32) {
    %c0_i32 = arith.constant 0 : i32
    %c0_i32_0 = arith.constant 0 : i32
    return %arg0, %c0_i32 : i32, i32
  }
  func.func @transform_1(%arg0: i32) -> (i32, i32) {
    %c0_i32 = arith.constant 0 : i32
    %c0_i32_0 = arith.constant 0 : i32
    %c0_i32_1 = arith.constant 0 : i32
    return %c0_i32, %c0_i32_0 : i32, i32
  }
  func.func @transform_2(%arg0: i32) -> (i32, i32) {
    %c0_i32 = arith.constant 0 : i32
    %c0_i32_0 = arith.constant 0 : i32
    %c0_i32_1 = arith.constant 0 : i32
    return %c0_i32, %c0_i32_0 : i32, i32
  }
  func.func @transform_3(%arg0: i32) -> (i32, i32) {
    %c0_i32 = arith.constant 0 : i32
    %c0_i32_0 = arith.constant 0 : i32
    %c0_i32_1 = arith.constant 0 : i32
    return %c0_i32, %c0_i32_0 : i32, i32
  }
  func.func @transform_4(%arg0: i32) -> (i32, i32) {
    %c0_i32 = arith.constant 0 : i32
    %c0_i32_0 = arith.constant 0 : i32
    %c0_i32_1 = arith.constant 0 : i32
    return %c0_i32, %c0_i32_0 : i32, i32
  }
  func.func @transform_5(%arg0: i32) -> (i32, i32) {
    %c0_i32 = arith.constant 0 : i32
    %c0_i32_0 = arith.constant 0 : i32
    %c0_i32_1 = arith.constant 0 : i32
    return %c0_i32, %c0_i32_0 : i32, i32
  }
  func.func @transform_6(%arg0: i32) -> (i32, i32) {
    %c0_i32 = arith.constant 0 : i32
    %c0_i32_0 = arith.constant 0 : i32
    %c0_i32_1 = arith.constant 0 : i32
    return %c0_i32, %c0_i32_0 : i32, i32
  }
  func.func @transform_7(%arg0: i32) -> (i32, i32) {
    %c0_i32 = arith.constant 0 : i32
    %c0_i32_0 = arith.constant 0 : i32
    return %arg0, %c0_i32 : i32, i32
  }
}

</mosaic_0001>

<bundles_post_ra>
// kernel: tpu_custom_call.1
= control target key start
LH: loop header
LB: loop body
LE: loop exit
PB: predicated region body
PF: predicated region fallthrough
CT: control target
= control target key end

     0   :  { %12 = vsyncpa [#allocation3], 0  ;;  %s757_s0 = inlined_call_operand.hbm [shape: f32[16,16], index: 0, kind: input, shape index: {}]   ;;  %s758_s1 = inlined_call_operand.hbm [shape: bf16[16,32], index: 1, kind: input, shape index: {}]   ;;  %s759_s2 = inlined_call_operand.hbm [shape: f32[1,32], index: 2, kind: input, shape index: {}]   ;;  %s760_s3 = inlined_call_operand.hbm [shape: bf16[32,32], index: 3, kind: input, shape index: {}]   ;;  %s761_s4 = inlined_call_operand.hbm [shape: f32[1,32], index: 4, kind: input, shape index: {}]   ;;  %s762_s5 = inlined_call_operand.hbm [shape: bf16[32,8], index: 5, kind: input, shape index: {}]   ;;  %s763_s6 = inlined_call_operand.hbm [shape: f32[1,8], index: 6, kind: input, shape index: {}]   ;;  %s764_s7 = inlined_call_operand.hbm [shape: f32[16,8], index: 7, kind: output, shape index: {}]  }
   0x1   :  { %13 = vsyncpa [#allocation6], 0 }
   0x2   :  { %14 = vsyncpa [#allocation9], 0 }
   0x3   :  { %15 = vsyncpa [#allocation12], 0 }
   0x4   :  { %16 = vsyncpa [#allocation4], 0  ;;  %s590_s24 = smov [#allocation5]   ;;  %s404_s28 = scalar_lea.hbm %s758_s1, 128 }
   0x5   :  { %s34_s25 = sshll.u32 %s590_s24, 4  ;;  %p405_p0 = scmp.ne.s32.totalorder %s758_s1, %s404_s28  ;;  %s35_s25 = int_to_ptr.vmem [resolvable:$true] %s34_s25 }
   0x6   :  { %p408_p1 = scmp.lt.u32.totalorder %s404_s28, %s758_s1 }
   0x8   :  { %p410_p2 = pnand %p408_p1, %p405_p0 }
   0xa   :  { %413 = shalt.err (!%p410_p2)
}
   0xb   :  { %s414_s10 = scalar_lea.vmem %s35_s25, 128  ;;  %p419_p4 = scmp.lt.s32.totalorder %s35_s25, %s35_s25 }
   0xc   :  { %p415_p3 = scmp.ne.s32.totalorder %s35_s25, %s414_s10  ;;  %p420_p5 = scmp.lt.s32.totalorder %s414_s10, %s414_s10 }
   0xe   :  { %p421_p6 = por %p420_p5, %p419_p4 }
  0x10   :  { %p422_p7 = pnand %p421_p6, %p415_p3 }
  0x12   :  { %425 = shalt.err (!%p422_p7)
}
  0x13   :  { %s591_s11 = smov 64   ;;  %s592_s12 = smov 4  }
  0x14   :  { %40 = dma.hbm_to_vmem [thread:$0]  %s758_s1, 128, %s35_s25, [#allocation6], %s591_s11, %s591_s11, %s592_s12  }
  0x15   :  { %s593_s15 = smov [#allocation8]   ;;  %s594_s17 = smov [#allocation11]  }
  0x16   :  { %s56_s16 = sshll.u32 %s593_s15, 4  ;;  %s78_s18 = sshll.u32 %s594_s17, 4  ;;  %s57_s16 = int_to_ptr.vmem [resolvable:$true] %s56_s16  ;;  %s79_s18 = int_to_ptr.vmem [resolvable:$true] %s78_s18 }
  0x17   :  { %s426_s21 = scalar_lea.hbm %s760_s3, 256 }
  0x18   :  { %p427_p8 = scmp.ne.s32.totalorder %s760_s3, %s426_s21  ;;  %p430_p9 = scmp.lt.u32.totalorder %s426_s21, %s760_s3 }
  0x1a   :  { %p432_p10 = pnand %p430_p9, %p427_p8 }
  0x1c   :  { %435 = shalt.err (!%p432_p10)
}
  0x1d   :  { %s436_s1 = scalar_lea.vmem %s57_s16, 256  ;;  %p441_p12 = scmp.lt.s32.totalorder %s57_s16, %s57_s16 }
  0x1e   :  { %p437_p11 = scmp.ne.s32.totalorder %s57_s16, %s436_s1  ;;  %p442_p13 = scmp.lt.s32.totalorder %s436_s1, %s436_s1 }
  0x20   :  { %p443_p0 = por %p442_p13, %p441_p12 }
  0x22   :  { %p444_p1 = pnand %p443_p0, %p437_p11 }
  0x24   :  { %447 = shalt.err (!%p444_p1)
}
  0x25   :  { %62 = dma.hbm_to_vmem [thread:$0]  %s760_s3, 256, %s57_s16, [#allocation9], %s591_s11, %s591_s11, %s592_s12  }
  0x26   :  { %s448_s30 = scalar_lea.hbm %s762_s5, 256 }
  0x27   :  { %p449_p2 = scmp.ne.s32.totalorder %s762_s5, %s448_s30  ;;  %p452_p3 = scmp.lt.u32.totalorder %s448_s30, %s762_s5 }
  0x29   :  { %p454_p4 = pnand %p452_p3, %p449_p2 }
  0x2b   :  { %457 = shalt.err (!%p454_p4)
}
  0x2c   :  { %s458_s14 = scalar_lea.vmem %s79_s18, 256  ;;  %p463_p6 = scmp.lt.s32.totalorder %s79_s18, %s79_s18 }
  0x2d   :  { %p459_p5 = scmp.ne.s32.totalorder %s79_s18, %s458_s14  ;;  %p464_p7 = scmp.lt.s32.totalorder %s458_s14, %s458_s14 }
  0x2f   :  { %p465_p8 = por %p464_p7, %p463_p6 }
  0x31   :  { %p466_p9 = pnand %p465_p8, %p459_p5 }
  0x33   :  { %469 = shalt.err (!%p466_p9)
}
  0x34   :  { %84 = dma.hbm_to_vmem [thread:$0]  %s762_s5, 256, %s79_s18, [#allocation12], %s591_s11, %s591_s11, %s592_s12  }
  0x35   :  { %s595_s16 = smov [#allocation2]   ;;  %s470_s21 = scalar_lea.hbm %s757_s0, 256 }
  0x36   :  { %s22_s17 = sshll.u32 %s595_s16, 4  ;;  %p471_p10 = scmp.ne.s32.totalorder %s757_s0, %s470_s21  ;;  %s23_s17 = int_to_ptr.vmem [resolvable:$true] %s22_s17 }
  0x37   :  { %p474_p11 = scmp.lt.u32.totalorder %s470_s21, %s757_s0 }
  0x39   :  { %p476_p12 = pnand %p474_p11, %p471_p10 }
  0x3b   :  { %479 = shalt.err (!%p476_p12)
}
  0x3c   :  { %s480_s1 = scalar_lea.vmem %s23_s17, 256  ;;  %p485_p0 = scmp.lt.s32.totalorder %s23_s17, %s23_s17 }
  0x3d   :  { %p481_p13 = scmp.ne.s32.totalorder %s23_s17, %s480_s1  ;;  %p486_p1 = scmp.lt.s32.totalorder %s480_s1, %s480_s1 }
  0x3f   :  { %p487_p2 = por %p486_p1, %p485_p0 }
  0x41   :  { %p488_p3 = pnand %p487_p2, %p481_p13 }
  0x43   :  { %491 = shalt.err (!%p488_p3)
}
  0x44   :  { %s596_s5 = smov 128   ;;  %s597_s11 = smov 8  }
  0x45   :  { %28 = dma.hbm_to_vmem [thread:$0]  %s757_s0, 256, %s23_s17, [#allocation3], %s596_s5, %s596_s5, %s597_s11  }
  0x46   :  { %s598_s25 = smov [#allocation7]   ;;  %s599_s28 = smov [#allocation10]  }
  0x47   :  { %s47_s27 = sshll.u32 %s598_s25, 4  ;;  %s69_s29 = sshll.u32 %s599_s28, 4  ;;  %s48_s27 = int_to_ptr.vmem [resolvable:$true] %s47_s27  ;;  %s70_s29 = int_to_ptr.vmem [resolvable:$true] %s69_s29 }
  0x48   :  { %s492_s9 = scalar_lea.hbm %s759_s2, 16 }
  0x49   :  { %p493_p4 = scmp.ne.s32.totalorder %s759_s2, %s492_s9  ;;  %p496_p5 = scmp.lt.u32.totalorder %s492_s9, %s759_s2 }
  0x4b   :  { %p498_p6 = pnand %p496_p5, %p493_p4 }
  0x4d   :  { %501 = shalt.err (!%p498_p6)
}
  0x4e   :  { %s502_s0 = scalar_lea.vmem %s48_s27, 16  ;;  %s506_s15 = scalar_lea.vmem %s48_s27, 32 }
  0x4f   :  { %p503_p7 = scmp.ne.s32.totalorder %s48_s27, %s502_s0  ;;  %p507_p8 = scmp.lt.s32.totalorder %s48_s27, %s48_s27 }
  0x50   :  { %p508_p9 = scmp.lt.s32.totalorder %s506_s15, %s502_s0 }
  0x52   :  { %p509_p10 = por %p508_p9, %p507_p8 }
  0x54   :  { %p510_p11 = pnand %p509_p10, %p503_p7 }
  0x56   :  { %513 = shalt.err (!%p510_p11)
}
  0x57   :  { %50 = dma.hbm_to_vmem [thread:$0]  %s759_s2, 16, %s48_s27, [#allocation6]  }
  0x58   :  { %s514_s21 = scalar_lea.hbm %s761_s4, 16 }
  0x59   :  { %p515_p12 = scmp.ne.s32.totalorder %s761_s4, %s514_s21  ;;  %p518_p13 = scmp.lt.u32.totalorder %s514_s21, %s761_s4 }
  0x5b   :  { %p520_p0 = pnand %p518_p13, %p515_p12 }
  0x5d   :  { %523 = shalt.err (!%p520_p0)
}
  0x5e   :  { %s524_s1 = scalar_lea.vmem %s70_s29, 16  ;;  %s528_s12 = scalar_lea.vmem %s70_s29, 32 }
  0x5f   :  { %p525_p1 = scmp.ne.s32.totalorder %s70_s29, %s524_s1  ;;  %p529_p2 = scmp.lt.s32.totalorder %s70_s29, %s70_s29 }
  0x60   :  { %p530_p3 = scmp.lt.s32.totalorder %s528_s12, %s524_s1 }
  0x62   :  { %p531_p4 = por %p530_p3, %p529_p2 }
  0x64   :  { %p532_p5 = pnand %p531_p4, %p525_p1 }
  0x66   :  { %535 = shalt.err (!%p532_p5)
}
  0x67   :  { %72 = dma.hbm_to_vmem [thread:$0]  %s761_s4, 16, %s70_s29, [#allocation9]  }
  0x68   :  { %s600_s25 = smov [#allocation13]   ;;  %s536_s8 = scalar_lea.hbm %s763_s6, 16 }
  0x69   :  { %s91_s27 = sshll.u32 %s600_s25, 4  ;;  %p537_p6 = scmp.ne.s32.totalorder %s763_s6, %s536_s8  ;;  %s92_s27 = int_to_ptr.vmem [resolvable:$true] %s91_s27 }
  0x6a   :  { %p540_p7 = scmp.lt.u32.totalorder %s536_s8, %s763_s6 }
  0x6c   :  { %p542_p8 = pnand %p540_p7, %p537_p6 }
  0x6e   :  { %545 = shalt.err (!%p542_p8)
}
  0x6f   :  { %s546_s3 = scalar_lea.vmem %s92_s27, 16  ;;  %s550_s4 = scalar_lea.vmem %s92_s27, 32 }
  0x70   :  { %p547_p9 = scmp.ne.s32.totalorder %s92_s27, %s546_s3  ;;  %p551_p10 = scmp.lt.s32.totalorder %s92_s27, %s92_s27 }
  0x71   :  { %p552_p11 = scmp.lt.s32.totalorder %s550_s4, %s546_s3 }
  0x73   :  { %p553_p12 = por %p552_p11, %p551_p10 }
  0x75   :  { %p554_p13 = pnand %p553_p12, %p547_p9 }
  0x77   :  { %557 = shalt.err (!%p554_p13)
}
  0x78   :  { %94 = dma.hbm_to_vmem [thread:$0]  %s763_s6, 16, %s92_s27, [#allocation12]  }
  0x79   :  { %580 = dma.done.wait [#allocation3], 256  }
  0x7a   :  { %581 = vsyncadd [#allocation3], 4294967040 }
  0x7b   :  { %582 = dma.done.wait [#allocation6], 144  }
  0x7c   :  { %583 = vsyncadd [#allocation6], 4294967152 }
  0x7d   :  { %584 = dma.done.wait [#allocation9], 272  }
  0x7e   :  { %585 = vsyncadd [#allocation9], 4294967024 }
  0x7f   :  { %586 = dma.done.wait [#allocation12], 272  }
  0x80   :  { %587 = vsyncadd [#allocation12], 4294967024  ;;  %v601_v0 = vmov 0.0   ;;  %vm602_vm0 = vmmov 0   ;;  %v399_v1 = vld [vmem:[#allocation5] sm:$0xff]   ;;  %v117_v2 = vld [vmem:[#allocation2] sm:$0xff] }
  0x81   :  { %363 = vmatprep.subr.bf16.mxu0 %v601_v0  ;;  %365 = vmatprep.mubr.msk.bf16.mxu0 %vm602_vm0, %v601_v0  ;;  %v118_v3 = vld [vmem:[#allocation2 + $0x8] sm:$0xff]  ;;  %vm135_vm1 = vcmask 130048   ;;  %v400_v5 = vld [vmem:[#allocation8] sm:$0xff]   ;;  %v344_v7 = vld [vmem:[#allocation7] ss:$0 sm:$0xff]  ;;  %vm206_vm2 = vcmask 261120  }
  0x82   :  { %369 = vmatprep.subr.bf16.mxu1 %v601_v0  ;;  %373 = vmatprep.mubr.msk.bf16.mxu1 %vm602_vm0, %v601_v0  ;;  %v119_v4 = vpack.c.bf16 %v118_v3, %v117_v2  ;;  %v401_v6 = vld [vmem:[#allocation8 + $0x8] sm:$0xff]   ;;  %v402_v17 = vld [vmem:[#allocation11] sm:$0xff]   ;;  %v403_v18 = vld [vmem:[#allocation11 + $0x8] sm:$0xff]   ;;  %vm321_vm3 = vcmask 64512   ;;  %s603_s6 = smov [#allocation14]  }
  0x83   :  { %364 = vmatpush3.bf16.msra.mxu0 %v399_v1  ;;  %370 = vmatpush3.bf16.msra.mxu1 %v400_v5  ;;  %v347_v19 = vld [vmem:[#allocation10] ss:$0 sm:$0xff]  ;;  %v351_v29 = vld [vmem:[#allocation13] ss:$0 sm:$0xff]  ;;  %s329_s15 = sshll.u32 %s603_s6, 4  ;;  %s330_s15 = int_to_ptr.vmem [resolvable:$true] %s329_s15 }
  0x84   :  { %377 = vmatprep.subr.bf16.mxu0 %v601_v0  ;;  %371 = vmatprep.subr.bf16.mxu1 %v601_v0  ;;  %s558_s16 = scalar_lea.vmem %s330_s15, 256  ;;  %p563_p1 = scmp.lt.s32.totalorder %s330_s15, %s330_s15 }
  0x85   :  { %p559_p0 = scmp.ne.s32.totalorder %s330_s15, %s558_s16  ;;  %p564_p2 = scmp.lt.s32.totalorder %s558_s16, %s558_s16 }
  0x86   :  { %366 = vmatmul.mubr.msk.bf16.vlgmr.msra.gmra.mrb[0].mxu0 %vm135_vm1, %v119_v4 }
  0x87   :  { %381 = vmatprep.mubr.msk.bf16.mxu0 %vm602_vm0, %v601_v0  ;;  %372 = vmatpush3.bf16.msra.mxu1 %v401_v6  ;;  %p565_p3 = por %p564_p2, %p563_p1 }
  0x88   :  { %378 = vmatpush3.bf16.msra.mxu0 %v402_v17 }
  0x89   :  { %379 = vmatprep.subr.bf16.mxu0 %v601_v0  ;;  %p566_p4 = pnand %p565_p3, %p559_p0 }
  0x8c   :  { %380 = vmatpush3.bf16.msra.mxu0 %v403_v18 }
 0x159   :  { %v173_v8 = vpop.f32.mrb[0].mxu0 }
 0x15a   :  { %v174_v9 = vadd.f32 %v344_v7, %v173_v8  ;;  %v367_v10 = vpop.f32.mrb[1].mxu0 }
 0x15b   :  { %v176_v11 = vpop.f32.mrb[2].mxu0 }
 0x15c   :  { %v177_v12 = vadd.f32 %v344_v7, %v176_v11  ;;  %v368_v13 = vpop.f32.mrb[3].mxu0  ;;  %v180_v14 = vmax.f32 %v174_v9, 0.0 }
 0x15e   :  { %v181_v15 = vmax.f32 %v177_v12, 0.0 }
 0x160   :  { %v182_v16 = vpack.c.bf16 %v181_v15, %v180_v14 }
 0x162   :  { %374 = vmatmul.mubr.msk.bf16.vlgmr.msra.gmra.mrb[0].mxu1 %vm206_vm2, %v182_v16 }
 0x235   :  { %v244_v20 = vpop.f32.mrb[0].mxu1 }
 0x236   :  { %v245_v21 = vadd.f32 %v347_v19, %v244_v20  ;;  %v375_v22 = vpop.f32.mrb[1].mxu1 }
 0x237   :  { %v247_v23 = vpop.f32.mrb[2].mxu1 }
 0x238   :  { %v248_v24 = vadd.f32 %v347_v19, %v247_v23  ;;  %v376_v25 = vpop.f32.mrb[3].mxu1  ;;  %v251_v26 = vmax.f32 %v245_v21, 0.0 }
 0x23a   :  { %v252_v27 = vmax.f32 %v248_v24, 0.0 }
 0x23c   :  { %v253_v28 = vpack.c.bf16 %v252_v27, %v251_v26 }
 0x23e   :  { %382 = vmatmul.mubr.msk.bf16.vlgmr.msra.gmra.mrb[4].mxu0 %vm206_vm2, %v253_v28 }
 0x311   :  { %v314_v30 = vpop.f32.mrb[4].mxu0 }
 0x312   :  { %v315_v31 = vadd.f32 %v351_v29, %v314_v30  ;;  %v383_v32 = vpop.f32.mrb[5].mxu0 }
 0x313   :  { %v317_v33 = vpop.f32.mrb[6].mxu0 }
 0x314   :  { %v318_v34 = vadd.f32 %v351_v29, %v317_v33  ;;  %v384_v35 = vpop.f32.mrb[7].mxu0  ;;  %322 = vst.msk [vmem:[#allocation14] sm:$0xff] %vm321_vm3, %v315_v31 }
 0x316   :  { %323 = vst.msk [vmem:[#allocation14 + $0x8] sm:$0xff] %vm321_vm3, %v318_v34 }
 0x317   :  { %569 = shalt.err (!%p566_p4)
}
 0x318   :  { %s570_s20 = scalar_lea.hbm %s764_s7, 256 }
 0x319   :  { %p571_p5 = scmp.ne.s32.totalorder %s764_s7, %s570_s20  ;;  %p574_p6 = scmp.lt.u32.totalorder %s570_s20, %s764_s7 }
 0x31b   :  { %p576_p7 = pnand %p574_p6, %p571_p5 }
 0x31d   :  { %579 = shalt.err (!%p576_p7)
}
 0x31e   :  { %335 = dma.vmem_to_hbm [thread:$0]  %s330_s15, 256, %s764_s7, [#allocation4], %s596_s5, %s596_s5, %s597_s11  }
 0x31f   :  { %588 = dma.done.wait [#allocation4], 256  }
 0x320   :  { %589 = vsyncadd [#allocation4], 4294967040 }
 0x321   :  { %339 = vsyncpa [#allocation3], 1 }
 0x322   :  { %340 = vsyncpa [#allocation6], 1 }
 0x323   :  { %341 = vsyncpa [#allocation9], 1 }
 0x324   :  { %342 = vsyncpa [#allocation12], 1 }
 0x325   :  { %343 = vsyncpa [#allocation4], 1 }

</bundles_post_ra>
